<compile_context>
chip_gen: v5e
topology: v5e:2x2
jax: 0.10.0
libtpu: 0.0.40
codegen_flags: <defaults>
</compile_context>

<pallas_src>
import functools

import jax
import jax.numpy as jnp
from jax.experimental import pallas as pl
from jax.experimental.pallas import tpu as pltpu


def _focal_ce_kernel(pred_ref, tgt_ref, awc_ref, out_ref, *,
                     gamma, eps, hw, tile_s, num_classes, needs_mask):
    s = pl.program_id(1)

    # Output block is the same (1,1,128) tile for every spatial step of this
    # batch -> VMEM-resident accumulator. Zero it on the first spatial step.
    @pl.when(s == 0)
    def _():
        out_ref[...] = jnp.zeros_like(out_ref)

    c, ts = num_classes, tile_s

    # (1, C, TS, 128) -> (C, TS, 128); channels lead, spatial is lane-dense.
    x = pred_ref[...].reshape(c, ts, 128).astype(jnp.float32)

    # Numerically stable softmax over the (small, leading) channel axis:
    # axis-0 reductions are elementwise vreg max/add (pure VPU).
    x_max = jnp.max(x, axis=0, keepdims=True)            # (1, TS, 128)
    ex = jnp.exp(x - x_max)                              # EUP, lane-dense
    denom = jnp.sum(ex, axis=0, keepdims=True)           # (1, TS, 128)
    inv_denom = 1.0 / denom                              # one recip per pixel
    p = ex * inv_denom + eps                             # input_soft + eps
    logp = jnp.log(p)                                    # EUP

    # (1 - p)^gamma : multiply chain for small integer gamma (avoids the
    # exp(gamma*log(x)) lowering of pow and its NaN for slightly-negative base).
    q = 1.0 - p
    g = float(gamma)
    if g == 0.0:
        w = jnp.ones_like(q)
    elif g == float(int(g)) and 1 <= int(g) <= 8:
        w = q
        for _ in range(int(g) - 1):
            w = w * q
    else:
        w = jnp.power(jnp.maximum(q, 0.0), g)

    # awc = (-alpha * class_weights), shape (C, 1, 128) -> broadcast over TS.
    focal = w * logp * awc_ref[...]                      # (C, TS, 128)

    # sum_c((onehot + eps) * focal) == focal[target] + eps * sum_c(focal)
    tgt = tgt_ref[...].reshape(ts, 128)                  # (TS, 128) int32
    ch = jax.lax.broadcasted_iota(jnp.int32, (c, ts, 128), 0)
    focal_at_t = jnp.sum(jnp.where(ch == tgt[None, :, :], focal, 0.0), axis=0)
    loss_pix = focal_at_t + eps * jnp.sum(focal, axis=0)  # (TS, 128)

    if needs_mask:
        # Mask pixels that are padding (lane pad or partially-OOB last tile).
        row = jax.lax.broadcasted_iota(jnp.int32, (ts, 128), 0)
        lane = jax.lax.broadcasted_iota(jnp.int32, (ts, 128), 1)
        flat = (s * ts + row) * 128 + lane
        loss_pix = jnp.where(flat < hw, loss_pix, 0.0)

    # Lane-dense partial sums: reduce only the sublane axis, keep 128 lanes.
    out_ref[...] += jnp.sum(loss_pix, axis=0, keepdims=True)[None]


def focal_cross_entropy_loss(prediction, target, class_weights,
                             gamma=2.0, alpha=1.0, eps=1e-8):
    """prediction: (B, C, H, W) float; target: (B, H, W) int; class_weights: (C,)."""
    b, c, h, w = prediction.shape
    hw = h * w
    n = b * hw

    # Layout-free reshapes: NCHW -> (B, C, HW) -> (B, C, S8, 128); target ->
    # (B, S8, 128). Padding only needed in the rare HW % 128 != 0 case.
    hw_pad = pl.cdiv(hw, 128) * 128
    pred_flat = prediction.reshape(b, c, hw)
    tgt_flat = target.reshape(b, hw).astype(jnp.int32)
    if hw_pad != hw:
        pred_flat = jnp.pad(pred_flat, ((0, 0), (0, 0), (0, hw_pad - hw)))
        tgt_flat = jnp.pad(tgt_flat, ((0, 0), (0, hw_pad - hw)))
    s8 = hw_pad // 128
    pred4 = pred_flat.reshape(b, c, s8, 128)
    tgt3 = tgt_flat.reshape(b, s8, 128)

    # Spatial tile: ~0.5 MiB of prediction per grid step (fits default scoped
    # VMEM on v5e/v6e/v7x with double buffering + ~7 live f32 temporaries).
    pred_block_bytes = 512 * 1024
    budget = max(1, pred_block_bytes // (c * 128 * 4))
    if s8 <= budget:
        tile_s = s8                       # full spatial extent -> always legal
    else:
        tile_s = max(8, (budget // 8) * 8)
        tile_s = min(tile_s, s8)          # multiple of 8, or == s8
    n_s_tiles = pl.cdiv(s8, tile_s)
    needs_mask = (n_s_tiles * tile_s * 128) != hw

    # Fold -alpha into the per-class weights; lane-replicated for broadcasting.
    awc = (-float(alpha)) * class_weights.astype(jnp.float32).reshape(c, 1, 1)
    awc = jnp.broadcast_to(awc, (c, 1, 128))

    kernel = functools.partial(
        _focal_ce_kernel,
        gamma=float(gamma), eps=float(eps), hw=hw,
        tile_s=tile_s, num_classes=c, needs_mask=needs_mask)

    out = pl.pallas_call(
        kernel,
        out_shape=jax.ShapeDtypeStruct((b, 1, 128), jnp.float32),
        grid_spec=pltpu.PrefetchScalarGridSpec(
            num_scalar_prefetch=0,
            grid=(b, n_s_tiles),
            in_specs=[
                pl.BlockSpec((1, c, tile_s, 128), lambda bi, si: (bi, 0, si, 0)),
                pl.BlockSpec((1, tile_s, 128), lambda bi, si: (bi, si, 0)),
                pl.BlockSpec((c, 1, 128), lambda bi, si: (0, 0, 0)),
            ],
            out_specs=pl.BlockSpec((1, 1, 128), lambda bi, si: (bi, 0, 0)),
        ),
        compiler_params=pltpu.CompilerParams(
            dimension_semantics=("parallel", "arbitrary")),
    )(pred4, tgt3, awc)

    # Tiny final reduction + mean in plain JAX.
    return jnp.sum(out) / jnp.float32(n)


def _reference(prediction, target, class_weights, gamma=2.0, alpha=1.0, eps=1e-8):
    # pure-JAX reference mirroring the torch code
    p = jax.nn.softmax(prediction, axis=1) + eps
    one_hot = jax.nn.one_hot(target, prediction.shape[1], axis=1,
                             dtype=jnp.float32) + eps
    wgt = jnp.power(1.0 - p, gamma)
    cw = class_weights.reshape(1, -1, 1, 1)
    focal = -alpha * wgt * jnp.log(p) * cw
    loss = jnp.sum(one_hot * focal, axis=1)
    return jnp.mean(loss)


if __name__ == "__main__":
    key = jax.random.PRNGKey(0)
    B, C, H, W = 2, 4, 16, 16
    k1, k2 = jax.random.split(key)
    prediction = jax.random.normal(k1, (B, C, H, W), dtype=jnp.float32)
    target = jax.random.randint(k2, (B, H, W), 0, C, dtype=jnp.int32)
    # deterministic "parameter": per-class weights
    class_weights = jnp.linspace(0.5, 2.0, C, dtype=jnp.float32)

    loss = focal_cross_entropy_loss(prediction, target, class_weights,
                                    gamma=2.0, alpha=1.0)
    loss = jax.block_until_ready(loss)

    ref = _reference(prediction, target, class_weights)
    assert jnp.allclose(loss, ref, rtol=1e-5, atol=1e-6), (loss, ref)
    print("KERNEL_OK")
</pallas_src>

<mosaic_0001>
module attributes {stable_mosaic.version = 11 : i64} {
  func.func @_focal_ce_kernel(%arg0: i32, %arg1: i32, %arg2: memref<1x4x2x128xf32, #tpu.memory_space<vmem>>, %arg3: memref<1x2x128xi32, #tpu.memory_space<vmem>>, %arg4: memref<4x1x128xf32, #tpu.memory_space<vmem>>, %arg5: memref<1x1x128xf32, #tpu.memory_space<vmem>>) attributes {dimension_semantics = [#tpu.dimension_semantics<parallel>, #tpu.dimension_semantics<arbitrary>], iteration_bounds = array<i64: 2, 1>, scalar_prefetch = 0 : i64, scratch_operands = 0 : i64, tpu.core_type = #tpu.core_type<tc>, window_params = [{transform_indices = @transform_0, window_bounds = array<i64: 1, 4, 2, 128>}, {transform_indices = @transform_1, window_bounds = array<i64: 1, 2, 128>}, {pipeline_mode = #tpu.pipeline_mode<synchronous>, transform_indices = @transform_2, window_bounds = array<i64: 4, 1, 128>}, {transform_indices = @transform_3, window_bounds = array<i64: 1, 1, 128>}]} {
    %c0_i32 = arith.constant 0 : i32
    %0 = arith.cmpi eq, %arg1, %c0_i32 : i32
    %1 = arith.extui %0 : i1 to i32
    %c0_i32_0 = arith.constant 0 : i32
    %2 = arith.cmpi ne, %1, %c0_i32_0 : i32
    scf.if %2 {
      %cst_25 = arith.constant 0.000000e+00 : f32
      %45 = vector.broadcast %cst_25 : f32 to vector<1x1x128xf32>
      %c0_26 = arith.constant 0 : index
      %c0_27 = arith.constant 0 : index
      %c0_28 = arith.constant 0 : index
      %46 = vector.load %arg5[%c0_26, %c0_27, %c0_28] : memref<1x1x128xf32, #tpu.memory_space<vmem>>, vector<1x1x128xf32>
      tpu.vector_store %arg5[%c0_26, %c0_27, %c0_28], %45 {strides = array<i32>} : memref<1x1x128xf32, #tpu.memory_space<vmem>>, vector<1x1x128xf32>,
    } else {
    }
    %c0 = arith.constant 0 : index
    %c0_1 = arith.constant 0 : index
    %c0_2 = arith.constant 0 : index
    %c0_3 = arith.constant 0 : index
    %3 = vector.load %arg2[%c0, %c0_1, %c0_2, %c0_3] : memref<1x4x2x128xf32, #tpu.memory_space<vmem>>, vector<1x4x2x128xf32>
    %4 = vector.shape_cast %3 : vector<1x4x2x128xf32> to vector<4x2x128xf32>
    %cst = arith.constant dense<0xFF800000> : vector<2x128xf32>
    %5 = vector.multi_reduction <maximumf>, %4, %cst [0] : vector<4x2x128xf32> to vector<2x128xf32>
    %6 = vector.shape_cast %5 : vector<2x128xf32> to vector<1x2x128xf32>
    %7 = vector.broadcast %6 : vector<1x2x128xf32> to vector<4x2x128xf32>
    %8 = arith.subf %4, %7 : vector<4x2x128xf32>
    %9 = math.exp %8 : vector<4x2x128xf32>
    %cst_4 = arith.constant dense<0.000000e+00> : vector<2x128xf32>
    %10 = vector.multi_reduction <add>, %9, %cst_4 [0] : vector<4x2x128xf32> to vector<2x128xf32>
    %11 = vector.shape_cast %10 : vector<2x128xf32> to vector<1x2x128xf32>
    %cst_5 = arith.constant 1.000000e+00 : f32
    %12 = vector.broadcast %cst_5 : f32 to vector<1x2x128xf32>
    %13 = arith.divf %12, %11 : vector<1x2x128xf32>
    %14 = vector.broadcast %13 : vector<1x2x128xf32> to vector<4x2x128xf32>
    %15 = arith.mulf %9, %14 : vector<4x2x128xf32>
    %cst_6 = arith.constant 9.99999993E-9 : f32
    %16 = vector.broadcast %cst_6 : f32 to vector<4x2x128xf32>
    %17 = arith.addf %15, %16 : vector<4x2x128xf32>
    %18 = math.log %17 : vector<4x2x128xf32>
    %cst_7 = arith.constant 1.000000e+00 : f32
    %19 = vector.broadcast %cst_7 : f32 to vector<4x2x128xf32>
    %20 = arith.subf %19, %17 : vector<4x2x128xf32>
    %21 = arith.mulf %20, %20 : vector<4x2x128xf32>
    %22 = arith.mulf %21, %18 : vector<4x2x128xf32>
    %c0_8 = arith.constant 0 : index
    %c0_9 = arith.constant 0 : index
    %c0_10 = arith.constant 0 : index
    %23 = vector.load %arg4[%c0_8, %c0_9, %c0_10] : memref<4x1x128xf32, #tpu.memory_space<vmem>>, vector<4x1x128xf32>
    %24 = vector.broadcast %23 : vector<4x1x128xf32> to vector<4x2x128xf32>
    %25 = arith.mulf %22, %24 : vector<4x2x128xf32>
    %c0_11 = arith.constant 0 : index
    %c0_12 = arith.constant 0 : index
    %c0_13 = arith.constant 0 : index
    %26 = vector.load %arg3[%c0_11, %c0_12, %c0_13] : memref<1x2x128xi32, #tpu.memory_space<vmem>>, vector<1x2x128xi32>
    %27 = vector.shape_cast %26 : vector<1x2x128xi32> to vector<2x128xi32>
    %28 = tpu.iota {dimensions = array<i32: 0>} : vector<4x2x128xi32>
    %29 = vector.shape_cast %27 : vector<2x128xi32> to vector<1x2x128xi32>
    %30 = vector.broadcast %29 : vector<1x2x128xi32> to vector<4x2x128xi32>
    %31 = arith.cmpi eq, %28, %30 : vector<4x2x128xi32>
    %cst_14 = arith.constant 0.000000e+00 : f32
    %32 = vector.broadcast %cst_14 : f32 to vector<4x2x128xf32>
    %33 = arith.select %31, %25, %32 : vector<4x2x128xi1>, vector<4x2x128xf32>
    %cst_15 = arith.constant dense<0.000000e+00> : vector<2x128xf32>
    %34 = vector.multi_reduction <add>, %33, %cst_15 [0] : vector<4x2x128xf32> to vector<2x128xf32>
    %cst_16 = arith.constant dense<0.000000e+00> : vector<2x128xf32>
    %35 = vector.multi_reduction <add>, %25, %cst_16 [0] : vector<4x2x128xf32> to vector<2x128xf32>
    %cst_17 = arith.constant 9.99999993E-9 : f32
    %36 = vector.broadcast %cst_17 : f32 to vector<2x128xf32>
    %37 = arith.mulf %36, %35 : vector<2x128xf32>
    %38 = arith.addf %34, %37 : vector<2x128xf32>
    %c0_18 = arith.constant 0 : index
    %c0_19 = arith.constant 0 : index
    %c0_20 = arith.constant 0 : index
    %39 = vector.load %arg5[%c0_18, %c0_19, %c0_20] : memref<1x1x128xf32, #tpu.memory_space<vmem>>, vector<1x1x128xf32>
    %cst_21 = arith.constant dense<0.000000e+00> : vector<128xf32>
    %40 = vector.multi_reduction <add>, %38, %cst_21 [0] : vector<2x128xf32> to vector<128xf32>
    %41 = vector.shape_cast %40 : vector<128xf32> to vector<1x128xf32>
    %42 = vector.shape_cast %41 : vector<1x128xf32> to vector<1x1x128xf32>
    %43 = arith.addf %39, %42 : vector<1x1x128xf32>
    %c0_22 = arith.constant 0 : index
    %c0_23 = arith.constant 0 : index
    %c0_24 = arith.constant 0 : index
    %44 = vector.load %arg5[%c0_22, %c0_23, %c0_24] : memref<1x1x128xf32, #tpu.memory_space<vmem>>, vector<1x1x128xf32>
    tpu.vector_store %arg5[%c0_22, %c0_23, %c0_24], %43 {strides = array<i32>} : memref<1x1x128xf32, #tpu.memory_space<vmem>>, vector<1x1x128xf32>,
    return
  }
  func.func @transform_0(%arg0: i32, %arg1: i32) -> (i32, i32, i32, i32) {
    %c0_i32 = arith.constant 0 : i32
    %c0_i32_0 = arith.constant 0 : i32
    %c0_i32_1 = arith.constant 0 : i32
    return %arg0, %c0_i32, %arg1, %c0_i32_0 : i32, i32, i32, i32
  }
  func.func @transform_1(%arg0: i32, %arg1: i32) -> (i32, i32, i32) {
    %c0_i32 = arith.constant 0 : i32
    %c0_i32_0 = arith.constant 0 : i32
    return %arg0, %arg1, %c0_i32 : i32, i32, i32
  }
  func.func @transform_2(%arg0: i32, %arg1: i32) -> (i32, i32, i32) {
    %c0_i32 = arith.constant 0 : i32
    %c0_i32_0 = arith.constant 0 : i32
    %c0_i32_1 = arith.constant 0 : i32
    %c0_i32_2 = arith.constant 0 : i32
    return %c0_i32, %c0_i32_0, %c0_i32_1 : i32, i32, i32
  }
  func.func @transform_3(%arg0: i32, %arg1: i32) -> (i32, i32, i32) {
    %c0_i32 = arith.constant 0 : i32
    %c0_i32_0 = arith.constant 0 : i32
    %c0_i32_1 = arith.constant 0 : i32
    return %arg0, %c0_i32, %c0_i32_0 : i32, i32, i32
  }
}

</mosaic_0001>

<bundles_post_ra>
// kernel: tpu_custom_call.1
= control target key start
LH: loop header
LB: loop body
LE: loop exit
PB: predicated region body
PF: predicated region fallthrough
CT: control target
= control target key end

     0   :  { %s1040_s0 = inlined_call_operand.hbm [shape: f32[2,4,2,128], index: 0, kind: input, shape index: {}]   ;;  %s1041_s1 = inlined_call_operand.hbm [shape: s32[2,2,128], index: 1, kind: input, shape index: {}]   ;;  %s1042_s2 = inlined_call_operand.hbm [shape: f32[4,1,128], index: 2, kind: input, shape index: {}]   ;;  %s1043_s3 = inlined_call_operand.hbm [shape: f32[2,1,128], index: 3, kind: output, shape index: {}]  }
   0x1   :  { %1045 = sst [smem:[#allocation14_spill]] %s1040_s0 }
   0x2   :  { %1046 = sst [smem:[#allocation15_spill]] %s1042_s2 }
   0x3   :  { %8 = vsyncpa [#allocation3], 0 }
   0x4   :  { %10 = vsyncpa [#allocation3 + $0x1], 0 }
   0x5   :  { %11 = vsyncpa [#allocation6], 0 }
   0x6   :  { %13 = vsyncpa [#allocation6 + $0x1], 0 }
   0x7   :  { %14 = vsyncpa [#allocation4], 0 }
   0x8   :  { %16 = vsyncpa [#allocation4 + $0x1], 0  ;;  %s849_s12 = smov 0   ;;  %s851_s13 = smov 0  }
   0x9   :  { %s853_s14 = smov 0   ;;  %s855_s15 = smov 0  }
   0xa   :  { %s857_s16 = smov 0   ;;  %s859_s17 = smov 0  }
   0xb LB: > { %s880_s18 = sadd.s32 4294967295, %s821_s17   ;;  %s520_s19 = sadd.s32 4294967294, %s821_s17   ;;  %s821_s17 = sphi %s859_s17, %s22_s17   ;;  %s817_s16 = sphi %s857_s16, %s1061_s16   ;;  %s813_s15 = sphi %s855_s15, %s1060_s15   ;;  %s809_s14 = sphi %s853_s14, %s1059_s14   ;;  %s805_s13 = sphi %s851_s13, %s1058_s13   ;;  %s801_s12 = sphi %s849_s12, %s1057_s12  }
   0xc   : > { %p56_p0 = scmp.ne.s32.totalorder %s805_s13, %s801_s12  ;;  %p57_p1 = scmp.eq.s32.totalorder %s880_s18, 0 }
   0xd   : > { %p129_p2 = scmp.eq.s32.totalorder %s880_s18, 1  ;;  %p135_p3 = scmp.eq.s32.totalorder %s520_s19, 1 }
   0xe   : > { %p889_p4 = por %p57_p1, %p56_p0  ;;  %p521_p5 = scmp.ge.s32.totalorder %s821_s17, 1 }
   0xf   : > { %p894_p6 = por %p135_p3, %p56_p0  ;;  %p142_p7 = scmp.lt.s32.totalorder %s821_s17, 3 }
  0x10   : > { %s1049_s2 = sld [smem:[#allocation15_spill]]  ;;  %s823_s26 = smov [#allocation7]  }
  0x11   : > { %p902_p8 = pnand %p521_p5, %p142_p7  ;;  %s155_s27 = sshll.u32 %s823_s26, 4  ;;  %s156_s27 = int_to_ptr.vmem [resolvable:$true] %s155_s27 }
  0x12   : > { %p523_p11 = scmp.ge.s32.totalorder %s821_s17, 2  ;;  %s824_s28 = smov 16  }
  0x13   : > { %p546_p9 = pneg %p902_p8  ;;  %s825_s29 = smov 1  }
  0x14   : > { %s34_s30 = sadd.s32 1, %s817_s16  ;;  %s43_s4 = sadd.s32 1, %s809_s14 }
  0x15   : > { %p547_p10 = pnand %p546_p9, %p57_p1  ;;  %p36_p12 = scmp.ge.s32.totalorder %s34_s30, 2 }
  0x16   : > { %s153_s24 = sshll.u32 %s1049_s2, 4  ;;  %p50_p13 = scmp.ne.s32.totalorder %s809_s14, %s805_s13  ;;  %s154_s24 = int_to_ptr.hbm [resolvable:$true] %s153_s24 }
  0x17   : > { %549 = dma.hbm_to_vmem [thread:$0]  (!%p547_p10), %s154_s24, 64, %s156_s27, [#allocation6], %s824_s28, %s824_s28, %s825_s29  }
  0x18   : > { %p51_p0 = scmp.eq.s32.totalorder %s821_s17, 0  ;;  %s1063_s30 = smov (%p36_p12, %s34_s30), 0 }
  0x19   : > { %1051 = sst [smem:[#allocation13_spill]] %s1063_s30  ;;  %p924_p5 = por %p129_p2, %p50_p13 }
  0x1a   : > { %p918_p3 = por %p51_p0, %p50_p13  ;;  %s38_s7 = ssub.s32 %s817_s16, %s1063_s30 }
  0x1b   : > { %p562_p7 = scmp.lt.s32.totalorder %s821_s17, 2  ;;  %p41_p9 = scmp.eq.s32.totalorder %s38_s7, 0 }
  0x1c   : > { %s169_s8 = sand.u32 1, %s809_s14   ;;  %s535_s11 = sshll.u32 %s817_s16, 3 }
  0x1d   : > { %s524_s9 = sshll.u32 %s169_s8, 3  ;;  %s1054_s0 = sld [smem:[#allocation14_spill]] }
  0x1e   : > { %s933_s10 = scalar_select %p41_p9, %s809_s14, %s43_s4  }
  0x1f   : > { %s173_s24 = scalar_lea.vmem [#allocation2], %s524_s9  ;;  %p941_p2 = pnand %p562_p7, %p918_p3 }
  0x20   : > { %s182_s26 = sshll.u32 %s173_s24, 4  ;;  %s192_s29 = sand.u32 1, %s821_s17   ;;  %s183_s26 = int_to_ptr.vmem [resolvable:$true] %s182_s26 }
  0x21   : > { %s170_s4 = scalar_lea.sflag [#allocation3], %s169_s8  ;;  %s826_s7 = smov 32  }
  0x22   : > { %s827_s2 = smov 2   ;;  %s527_s19 = sshll.u32 %s169_s8, 1 }
  0x23   : > { %s179_s23 = scalar_lea.hbm %s1054_s0, %s535_s11  ;;  %s528_s11 = sshll.u32 %s817_s16, 1 }
  0x24   : > { %s180_s27 = sshll.u32 %s179_s23, 4  ;;  %s201_s23 = scalar_lea.hbm %s1041_s1, %s528_s11  ;;  %s181_s27 = int_to_ptr.hbm [resolvable:$true] %s180_s27 }
  0x25   : > { %553 = dma.hbm_to_vmem [thread:$0]  (!%p941_p2), %s181_s27, 128, %s183_s26, %s170_s4, %s826_s7, %s826_s7, %s827_s2  }
  0x26   : > { %s196_s24 = scalar_lea.vmem [#allocation5], %s527_s19  ;;  %s203_s0 = sshll.u32 %s201_s23, 4  ;;  %s204_s0 = int_to_ptr.hbm [resolvable:$true] %s203_s0 }
  0x27   : > { %s205_s5 = sshll.u32 %s196_s24, 4  ;;  %s193_s30 = scalar_lea.sflag [#allocation6], %s192_s29  ;;  %s206_s5 = int_to_ptr.vmem [resolvable:$true] %s205_s5 }
  0x28   : > { %556 = dma.hbm_to_vmem [thread:$0]  (!%p941_p2), %s204_s0, 32, %s206_s5, %s193_s30  }
  0x29   : > { %214 = sbr.rel (%p902_p8) target bundleno = 143 (0x8f), region = 32  ;;  %s957_s2 = sand.u32 (!%p902_p8), 1, %s805_s13  }
  0x2a   : > { %s530_s8 = sshll.u32 (!%p902_p8), %s957_s2, 3  ;;  %s217_s26 = scalar_lea.sflag (!%p902_p8), [#allocation3], %s957_s2 }
  0x2b   : > { %s220_s27 = scalar_lea.vmem (!%p902_p8), [#allocation2], %s530_s8 }
  0x2e   : > { %784 = dma.done.wait (%p889_p4), %s217_s26, 128  }
  0x2f   : > { %786 = vsyncadd (%p889_p4), %s217_s26, 4294967168  ;;  %s226_s0 = sand.u32 1, %s880_s18   ;;  %s531_s25 = sshll.u32 %s957_s2, 1 }
  0x30   : > { %s227_s30 = scalar_lea.sflag [#allocation6], %s226_s0  ;;  %s967_s28 = scalar_lea.vmem [#allocation5], %s531_s25 }
  0x31   : > { %788 = dma.done.wait (%p889_p4), %s227_s30, 32  }
  0x32   : > { %790 = vsyncadd (%p889_p4), %s227_s30, 4294967264 }
  0x33   : > { %792 = dma.done.wait (%p57_p1), [#allocation6], 64  }
  0x34   : > { %794 = vsyncadd (%p57_p1), [#allocation6], 4294967232  ;;  %s978_s29 = scalar_lea.vmem [#allocation8], %s957_s2  ;;  %v828_v0 = vmov 0.0   ;;  %vm272_vm0 = vcmask 1041408   ;;  %s406_s4 = scalar_lea.hbm %s1043_s3, %s813_s15 }
  0x35   : > { %267 = vst [vmem:[%s978_s29] sm:$0x1] %v828_v0  ;;  %v268_v1 = vld [vmem:[%s220_s27] sm:$0x3]  ;;  %v269_v2 = vld [vmem:[%s220_s27 + $0x2] sm:$0x3]  ;;  %s408_s7 = sshll.u32 %s978_s29, 4  ;;  %s409_s7 = int_to_ptr.vmem [resolvable:$true] %s408_s7 }
  0x36   : > { %v270_v3 = vld [vmem:[%s220_s27 + $0x4] sm:$0x3]  ;;  %v271_v4 = vld [vmem:[%s220_s27 + $0x6] sm:$0x3]  ;;  %v273_v5 = vsel %vm272_vm0, %v268_v1, -inf  ;;  %v274_v6 = vsel %vm272_vm0, %v269_v2, -inf }
  0x37   : > { %v275_v7 = vsel %vm272_vm0, %v270_v3, -inf  ;;  %v276_v8 = vsel %vm272_vm0, %v271_v4, -inf  ;;  %v277_v9 = vmax.f32 %v273_v5, %v274_v6  ;;  %v619_v59 = vld [vmem:[#allocation7] ss:$0 sm:$0xff]  ;;  %v362_v60 = vld [vmem:[%s967_s28] sm:$0x3] }
  0x38   : > { %v278_v10 = vmax.f32 %v275_v7, %v276_v8  ;;  %v620_v0 = vld [vmem:[#allocation7 + $0x1] ss:$0 sm:$0xff]  ;;  %v622_v7 = vld [vmem:[#allocation7 + $0x3] ss:$0 sm:$0xff]  ;;  %vm363_vm5 = vcmp.eq.s32.totalorder %v362_v60, 0  ;;  %vm364_vm6 = vcmp.eq.s32.totalorder %v362_v60, 1 }
  0x39   : > { %vm365_vm7 = vcmp.eq.s32.totalorder %v362_v60, 2  ;;  %vm366_vm8 = vcmp.eq.s32.totalorder %v362_v60, 3  ;;  %s410_s19 = sshll.u32 %s406_s4, 4  ;;  %s398_s11 = scalar_lea.sflag [#allocation4], %s957_s2  ;;  %s411_s19 = int_to_ptr.hbm [resolvable:$true] %s410_s19 }
  0x3a   : > { %v279_v11 = vmax.f32 %v277_v9, %v278_v10  ;;  %s745_s9 = sshra.s32 %s411_s19, 4  ;;  %s751_s15 = scalar_lea.hbm %s1043_s3, 2  ;;  %s746_s9 = int_to_ptr.hbm [resolvable:$true] %s745_s9 }
  0x3b   : > { %s747_s22 = scalar_lea.hbm %s746_s9, 1  ;;  %p752_p10 = scmp.lt.s32.totalorder %s746_s9, %s1043_s3 }
  0x3c   : > { %v280_v12 = vsub.f32 %v268_v1, %v279_v11  ;;  %v281_v13 = vsub.f32 %v269_v2, %v279_v11  ;;  %v282_v14 = vsub.f32 %v270_v3, %v279_v11  ;;  %v283_v15 = vsub.f32 %v271_v4, %v279_v11  ;;  %v621_v4 = vld [vmem:[#allocation7 + $0x2] ss:$0 sm:$0xff]  ;;  %p748_p1 = scmp.ne.s32.totalorder %s746_s9, %s747_s22  ;;  %p753_p12 = scmp.lt.s32.totalorder %s751_s15, %s747_s22 }
  0x3e   : > { %v284_v16 = vmul.f32 1.442695, %v280_v12  ;;  %v286_v17 = vmul.f32 1.442695, %v281_v13  ;;  %v288_v18 = vmul.f32 1.442695, %v282_v14  ;;  %p749_p4 = pnand %p748_p1, %p924_p5  ;;  %p754_p13 = por %p753_p12, %p752_p10 }
  0x3f   : > { %v290_v19 = vmul.f32 1.442695, %v283_v15 }
  0x40   : > { %623 = vpow2.f32 %v284_v16  ;;  %p750_p8 = pneg %p749_p4 }
  0x41   : > { %625 = vpow2.f32 %v286_v17 }
  0x42   : > { %627 = vpow2.f32 %v288_v18  ;;  %p755_p0 = pnand %p754_p13, %p750_p8 }
  0x43   : > { %629 = vpow2.f32 %v290_v19 }
  0x46   : > { %v624_v20 = vpop.eup %623 }
  0x47   : > { %v626_v21 = vpop.eup %625  ;;  %v292_v22 = vsel %vm272_vm0, %v624_v20, 0.0 }
  0x48   : > { %v628_v23 = vpop.eup %627  ;;  %v293_v24 = vsel %vm272_vm0, %v626_v21, 0.0 }
  0x49   : > { %v630_v25 = vpop.eup %629  ;;  %v294_v26 = vadd.f32 %v293_v24, %v292_v22  ;;  %v295_v27 = vsel %vm272_vm0, %v628_v23, 0.0 }
  0x4a   : > { %v297_v28 = vsel %vm272_vm0, %v630_v25, 0.0 }
  0x4b   : > { %v296_v29 = vadd.f32 %v295_v27, %v294_v26 }
  0x4d   : > { %v298_v30 = vadd.f32 %v297_v28, %v296_v29 }
  0x4f   : > { %631 = vrcp.f32 %v298_v30  ;;  %v310_v33 = vand.u32 2147483648, %v298_v30  ;;  %vm304_vm1 = vweird.f32 %v298_v30  ;;  %v308_v35 = vand.u32 2147483647, %v298_v30 }
  0x51   : > { %v311_v37 = vor.u32 1.1754944e-38, %v310_v33  ;;  %vm309_vm4 = vcmp.eq.f32.partialorder %v308_v35, 8.507059e+37 }
  0x55   : > { %v632_v31 = vpop.eup %631 }
  0x56   : > { %v300_v32 = vmul.f32 %v632_v31, %v298_v30  ;;  %vm305_vm2 = vweird.f32 %v632_v31 }
  0x57   : > { %vm306_vm3 = vmor %vm304_vm1, %vm305_vm2 }
  0x58   : > { %v301_v34 = vsub.f32 1.0, %v300_v32 }
  0x5a   : > { %v302_v36 = vmul.f32 %v632_v31, %v301_v34 }
  0x5c   : > { %v303_v38 = vadd.f32 %v632_v31, %v302_v36 }
  0x5e   : > { %v307_v39 = vsel %vm306_vm3, %v632_v31, %v303_v38 }
  0x5f   : > { %v312_v40 = vsel %vm309_vm4, %v311_v37, %v307_v39 }
  0x60   : > { %v314_v41 = vmul.f32 %v624_v20, %v312_v40  ;;  %v315_v42 = vmul.f32 %v626_v21, %v312_v40  ;;  %v316_v43 = vmul.f32 %v628_v23, %v312_v40  ;;  %v317_v44 = vmul.f32 %v630_v25, %v312_v40  ;;  %v387_v40 = vld [vmem:[%s978_s29] sm:$0x1] }
  0x62   : > { %v318_v45 = vadd.f32 1e-08, %v314_v41  ;;  %v319_v46 = vadd.f32 1e-08, %v315_v42  ;;  %v320_v47 = vadd.f32 1e-08, %v316_v43 }
  0x63   : > { %v321_v48 = vadd.f32 1e-08, %v317_v44 }
  0x64   : > { %633 = vlog2.f32 %v318_v45  ;;  %v330_v49 = vsub.f32 1.0, %v318_v45  ;;  %v331_v50 = vsub.f32 1.0, %v319_v46  ;;  %v332_v51 = vsub.f32 1.0, %v320_v47 }
  0x65   : > { %635 = vlog2.f32 %v319_v46  ;;  %v333_v52 = vsub.f32 1.0, %v321_v48 }
  0x66   : > { %637 = vlog2.f32 %v320_v47  ;;  %v334_v53 = vmul.f32 %v330_v49, %v330_v49  ;;  %v335_v55 = vmul.f32 %v331_v50, %v331_v50  ;;  %v336_v58 = vmul.f32 %v332_v51, %v332_v51 }
  0x67   : > { %639 = vlog2.f32 %v321_v48  ;;  %v337_v63 = vmul.f32 %v333_v52, %v333_v52 }
  0x6a   : > { %v634_v54 = vpop.eup %633 }
  0x6b   : > { %v636_v56 = vpop.eup %635  ;;  %v323_v57 = vmul.f32 0.6931472, %v634_v54 }
  0x6c   : > { %v638_v61 = vpop.eup %637  ;;  %v325_v62 = vmul.f32 0.6931472, %v636_v56 }
  0x6d   : > { %v640_v1 = vpop.eup %639  ;;  %v327_v2 = vmul.f32 0.6931472, %v638_v61  ;;  %v338_v3 = vmul.f32 %v334_v53, %v323_v57 }
  0x6e   : > { %v329_v5 = vmul.f32 0.6931472, %v640_v1  ;;  %v339_v6 = vmul.f32 %v335_v55, %v325_v62 }
  0x6f   : > { %v340_v8 = vmul.f32 %v336_v58, %v327_v2  ;;  %v358_v9 = vmul.f32 %v619_v59, %v338_v3 }
  0x70   : > { %v341_v10 = vmul.f32 %v337_v63, %v329_v5  ;;  %v359_v11 = vmul.f32 %v620_v0, %v339_v6 }
  0x71   : > { %v360_v12 = vmul.f32 %v621_v4, %v340_v8  ;;  %v367_v13 = vsel %vm363_vm5, %v358_v9, 0.0  ;;  %v378_v14 = vsel %vm272_vm0, %v358_v9, 0.0 }
  0x72   : > { %v361_v15 = vmul.f32 %v622_v7, %v341_v10  ;;  %v368_v16 = vsel %vm364_vm6, %v359_v11, 0.0  ;;  %v371_v17 = vsel %vm272_vm0, %v367_v13, 0.0  ;;  %v379_v18 = vsel %vm272_vm0, %v359_v11, 0.0 }
  0x73   : > { %v369_v19 = vsel %vm365_vm7, %v360_v12, 0.0  ;;  %v372_v20 = vsel %vm272_vm0, %v368_v16, 0.0  ;;  %v380_v21 = vadd.f32 %v379_v18, %v378_v14  ;;  %v381_v22 = vsel %vm272_vm0, %v360_v12, 0.0 }
  0x74   : > { %v370_v23 = vsel %vm366_vm8, %v361_v15, 0.0  ;;  %v373_v24 = vadd.f32 %v372_v20, %v371_v17  ;;  %v374_v25 = vsel %vm272_vm0, %v369_v19, 0.0  ;;  %v383_v26 = vsel %vm272_vm0, %v361_v15, 0.0 }
  0x75   : > { %v376_v27 = vsel %vm272_vm0, %v370_v23, 0.0  ;;  %v382_v28 = vadd.f32 %v381_v22, %v380_v21 }
  0x76   : > { %v375_v29 = vadd.f32 %v374_v25, %v373_v24 }
  0x77   : > { %v384_v30 = vadd.f32 %v383_v26, %v382_v28 }
  0x78   : > { %v377_v31 = vadd.f32 %v376_v27, %v375_v29 }
  0x79   : > { %v385_v32 = vmul.f32 1e-08, %v384_v30 }
  0x7b   : > { %v386_v33 = vadd.f32 %v385_v32, %v377_v31 }
  0x7d   : > { %v388_v34 = vsel %vm272_vm0, %v386_v33, 0.0 }
  0x7e   : > { %v389_v35 = vrot.slane %v388_v34, 4 }
  0x80   : > { %v390_v36 = vadd.f32 %v389_v35, %v388_v34 }
  0x82   : > { %v391_v37 = vrot.slane %v390_v36, 2 }
  0x84   : > { %v392_v38 = vadd.f32 %v391_v37, %v390_v36 }
  0x86   : > { %v393_v39 = vrot.slane %v392_v38, 1 }
  0x88   : > { %v394_v41 = vadd.f32 %v393_v39, %v392_v38 }
  0x8a   : > { %v395_v42 = vadd.f32 %v394_v41, %v387_v40 }
  0x8c   : > { %396 = vst [vmem:[%s978_s29] sm:$0x1] %v395_v42 }
  0x8d   : > { %758 = shalt.err (!%p755_p0)
}
  0x8e   : > { %544 = dma.vmem_to_hbm [thread:$0]  (%p924_p5), %s409_s7, 16, %s411_s19, %s398_s11  }
  0x8f PF: > { %s422_s2 = sand.u32 1, %s801_s12   ;;  %p558_p3 = pnand %p523_p11, %p894_p6 }
  0x90   : > { %s423_s26 = scalar_lea.sflag [#allocation4], %s422_s2 }
  0x91   : > { %p559_p7 = pneg %p558_p3 }
  0x93   : > { %796 = dma.done.wait (%p559_p7), %s423_s26, 16  }
  0x94   : > { %798 = vsyncadd (%p559_p7), %s423_s26, 4294967280  ;;  %s22_s17 = sadd.s32 1, %s821_s17   ;;  %s1056_s6 = sld [smem:[#allocation13_spill]] }
  0x95   : > { %p19_p9 = scmp.ge.s32.totalorder %s22_s17, 4   ;;  %s1057_s12 = smov %s805_s13 }
  0x96   : > { %s1058_s13 = smov %s809_s14  ;;  %s1059_s14 = smov %s933_s10 }
  0x97   : > { %s1060_s15 = smov %s817_s16  ;;  %21 = sbr.rel (!%p19_p9) target bundleno = 11 (0xb), region = 98 }
  0x9a   : > { %s1061_s16 = smov %s1056_s6 }
  0x9c   :  { %428 = vsyncpa [#allocation3], 1 }
  0x9d   :  { %430 = vsyncpa [#allocation3 + $0x1], 1 }
  0x9e   :  { %431 = vsyncpa [#allocation6], 1 }
  0x9f   :  { %433 = vsyncpa [#allocation6 + $0x1], 1 }
  0xa0   :  { %434 = vsyncpa [#allocation4], 1 }
  0xa1   :  { %436 = vsyncpa [#allocation4 + $0x1], 1 }

</bundles_post_ra>
